<compile_context>
chip_gen: v7x
topology: tpu7x:2x2x1
jax: 0.10.0
libtpu: 0.0.40
codegen_flags: <defaults>
</compile_context>

<pallas_src>
from functools import partial

import jax
import jax.numpy as jnp
from jax import lax
from jax.experimental import pallas as pl
from jax.experimental.pallas import tpu as pltpu

EPS = 1e-5
TARGET_TILE_BYTES = 2 * 1024 * 1024  # ~2 MiB per x block in the two-pass path


def _detect_vmem_limit() -> int:
    """Scoped-VMEM request sized per chip generation (with headroom)."""
    cap = None
    try:
        info = pltpu.get_tpu_info()
        for name in ("vmem_capacity_bytes", "vmem_bytes", "vmem_size_bytes"):
            v = getattr(info, name, None)
            if v:
                cap = int(v)
                break
    except Exception:
        cap = None
    if not cap:
        cap = 64 * 1024 * 1024  # conservative: v7x physical per-core VMEM
    # leave 16 MiB headroom; never ask below 32 MiB or above 96 MiB
    return max(32 * 1024 * 1024, min(cap - 16 * 1024 * 1024, 96 * 1024 * 1024))


VMEM_LIMIT = _detect_vmem_limit()


def _valid_channel_blocks(C: int):
    """Divisors of C (descending) that satisfy the sublane constraint."""
    return [d for d in range(C, 0, -1) if C % d == 0 and (d == C or d % 8 == 0)]


def _pick_fused_tc(N, C, HW, itemsize, vmem_limit):
    """Largest channel block whose fused slab fits VMEM; prefer >=2 blocks."""
    budget = vmem_limit - 2 * 1024 * 1024

    def cost(tc):
        slab_in = N * tc * HW * itemsize      # double-buffered in + out
        slab_f32 = N * tc * HW * 4            # f32 intermediates headroom
        return 4 * slab_in + 2 * slab_f32

    valid = _valid_channel_blocks(C)
    fits = [d for d in valid if cost(d) <= budget]
    if not fits:
        return None
    split = [d for d in fits if C // d >= 2]  # >=2 blocks -> megacore + pipelining
    return split[0] if split else fits[0]


def _pick_two_pass_tiles(N, C, HW, itemsize, target_bytes):
    """Bytes-based (bn, tc, tm) tiling for the streaming two-pass fallback."""
    cvalid = _valid_channel_blocks(C)
    preferred = [d for d in cvalid if C // d >= 2 and d * 128 * itemsize <= target_bytes]
    csplit = [d for d in cvalid if C // d >= 2]
    tc = (preferred or csplit or cvalid)[0]

    mvalid = [d for d in range(HW, 0, -1) if HW % d == 0 and (d == HW or d % 128 == 0)]
    mfit = [d for d in mvalid if tc * d * itemsize <= target_bytes]
    tm = mfit[0] if mfit else mvalid[-1]

    nvalid = [d for d in range(N, 0, -1) if N % d == 0]
    nfit = [d for d in nvalid if d * tc * tm * itemsize <= target_bytes]
    bn = nfit[0] if nfit else 1
    return tc, tm, bn


# --------------------------------------------------------------------------
# Fused single-read kernel: stats + normalization per channel-block slab.
# --------------------------------------------------------------------------
def fused_kernel(x_ref, gamma_ref, beta_ref, o_ref):
    n_, tc_, hw_ = x_ref.shape
    inv_m = 1.0 / float(n_ * hw_)

    x = x_ref[...].astype(jnp.float32)                 # (N, tc, HW)
    xs = jnp.sum(x, axis=0)                            # (tc, HW)  VPU adds over N
    xq = jnp.sum(x * x, axis=0)
    s = jnp.sum(xs, axis=1, keepdims=True)             # (tc, 1)   lane reduce
    q = jnp.sum(xq, axis=1, keepdims=True)

    mean = s * inv_m
    var = jnp.maximum(q * inv_m - mean * mean, 0.0)     # biased variance
    inv = lax.rsqrt(var + EPS)                          # EUP
    scale = gamma_ref[...] * inv                        # (tc, 1)
    shift = beta_ref[...] - mean * scale

    o_ref[...] = (x * scale[None] + shift[None]).astype(o_ref.dtype)


# --------------------------------------------------------------------------
# Two-pass fallback: pass 1 accumulates per-channel sum / sumsq directly into
# (C, 128) output refs (resident across the "arbitrary" n,m axes).
# --------------------------------------------------------------------------
def stats_kernel(x_ref, sum_ref, sq_ref):
    n = pl.program_id(1)
    m = pl.program_id(2)

    @pl.when(jnp.logical_and(n == 0, m == 0))
    def _():
        sum_ref[...] = jnp.zeros_like(sum_ref)
        sq_ref[...] = jnp.zeros_like(sq_ref)

    _, tc, tm = x_ref.shape
    x = x_ref[...].astype(jnp.float32)                  # (bn, tc, tm)
    xs = jnp.sum(x, axis=0)                             # (tc, tm)  VPU adds over bn
    xq = jnp.sum(x * x, axis=0)

    if tm % 128 == 0:
        # Deferred lane reduction: fold 128-lane chunks with VPU adds only;
        # the final 128->1 reduce happens once on the host.
        reps = tm // 128
        fs = xs[:, 0:128]
        fq = xq[:, 0:128]
        for j in range(1, reps):
            fs = fs + xs[:, j * 128:(j + 1) * 128]
            fq = fq + xq[:, j * 128:(j + 1) * 128]
        sum_ref[...] += fs
        sq_ref[...] += fq
    else:
        # Odd spatial sizes: reduce lanes here, replicate across the 128 lanes
        # of the accumulator (host then reads column 0).
        ps = jnp.sum(xs, axis=1, keepdims=True)          # (tc, 1)
        pq = jnp.sum(xq, axis=1, keepdims=True)
        sum_ref[...] += jnp.broadcast_to(ps, (tc, 128))
        sq_ref[...] += jnp.broadcast_to(pq, (tc, 128))


def affine_kernel(x_ref, scale_ref, shift_ref, o_ref):
    # y = x * scale + shift; scale/shift arrive lane-replicated as (tc, 128).
    _, tc, tm = x_ref.shape
    x = x_ref[...].astype(jnp.float32)                   # (bn, tc, tm)
    if tm % 128 == 0:
        reps = tm // 128
        sc = jnp.tile(scale_ref[...], (1, reps))          # (tc, tm) lane-aligned
        sh = jnp.tile(shift_ref[...], (1, reps))
    else:
        sc = scale_ref[:, 0:1]                            # (tc, 1) splat over lanes
        sh = shift_ref[:, 0:1]
    o_ref[...] = (x * sc[None] + sh[None]).astype(o_ref.dtype)


@partial(jax.jit, static_argnames=("force_two_pass", "target_tile_bytes"))
def ste_bnorm_forward(x_nchw, gamma, beta, *, force_two_pass=False,
                      target_tile_bytes=TARGET_TILE_BYTES):
    """Training-mode BatchNorm2d with merged STE params. x_nchw: (N, C, H, W)."""
    N, C, H, W = x_nchw.shape
    HW = H * W
    M = N * HW
    itemsize = jnp.dtype(x_nchw.dtype).itemsize
    x3 = x_nchw.reshape(N, C, HW)                         # free reshape, native layout

    gamma_f = gamma.astype(jnp.float32).reshape(C, 1)
    beta_f = beta.astype(jnp.float32).reshape(C, 1)

    fused_tc = None if force_two_pass else _pick_fused_tc(N, C, HW, itemsize, VMEM_LIMIT)

    # ---------------- fused single-read path ----------------
    if fused_tc is not None:
        tc = fused_tc
        out3 = pl.pallas_call(
            fused_kernel,
            out_shape=jax.ShapeDtypeStruct((N, C, HW), x_nchw.dtype),
            grid_spec=pltpu.PrefetchScalarGridSpec(
                num_scalar_prefetch=0,
                grid=(C // tc,),
                in_specs=[pl.BlockSpec((N, tc, HW), lambda c: (0, c, 0)),
                          pl.BlockSpec((tc, 1), lambda c: (c, 0)),
                          pl.BlockSpec((tc, 1), lambda c: (c, 0))],
                out_specs=pl.BlockSpec((N, tc, HW), lambda c: (0, c, 0)),
            ),
            compiler_params=pltpu.CompilerParams(
                dimension_semantics=("parallel",),
                vmem_limit_bytes=VMEM_LIMIT,
            ),
        )(x3, gamma_f, beta_f)
        return out3.reshape(N, C, H, W)

    # ---------------- two-pass streaming fallback ----------------
    tc, tm, bn = _pick_two_pass_tiles(N, C, HW, itemsize, target_tile_bytes)
    grid = (C // tc, N // bn, HW // tm)

    x_spec = pl.BlockSpec((bn, tc, tm), lambda c, n, m: (n, c, m))
    stat_spec = pl.BlockSpec((tc, 128), lambda c, n, m: (c, 0))

    sum_out, sq_out = pl.pallas_call(
        stats_kernel,
        out_shape=(jax.ShapeDtypeStruct((C, 128), jnp.float32),
                   jax.ShapeDtypeStruct((C, 128), jnp.float32)),
        grid_spec=pltpu.PrefetchScalarGridSpec(
            num_scalar_prefetch=0,
            grid=grid,
            in_specs=[x_spec],
            out_specs=(stat_spec, stat_spec),
        ),
        compiler_params=pltpu.CompilerParams(
            dimension_semantics=("parallel", "arbitrary", "arbitrary"),
            vmem_limit_bytes=VMEM_LIMIT,
        ),
    )(x3)

    if tm % 128 == 0:
        ch_sum = jnp.sum(sum_out, axis=1)                 # fold the deferred lanes
        ch_sq = jnp.sum(sq_out, axis=1)
    else:
        ch_sum = sum_out[:, 0]                            # lanes are replicas
        ch_sq = sq_out[:, 0]

    # Fold normalization into a per-channel affine (C-length math only).
    mean = ch_sum / M
    var = jnp.maximum(ch_sq / M - mean * mean, 0.0)
    inv = lax.rsqrt(var + EPS)
    scale = gamma_f[:, 0] * inv
    shift = beta_f[:, 0] - mean * scale
    scale_b = jnp.broadcast_to(scale.reshape(C, 1), (C, 128))
    shift_b = jnp.broadcast_to(shift.reshape(C, 1), (C, 128))

    out3 = pl.pallas_call(
        affine_kernel,
        out_shape=jax.ShapeDtypeStruct((N, C, HW), x_nchw.dtype),
        grid_spec=pltpu.PrefetchScalarGridSpec(
            num_scalar_prefetch=0,
            grid=grid,
            in_specs=[x_spec, stat_spec, stat_spec],
            out_specs=x_spec,
        ),
        compiler_params=pltpu.CompilerParams(
            dimension_semantics=("parallel", "parallel", "parallel"),
            vmem_limit_bytes=VMEM_LIMIT,
        ),
    )(x3, scale_b, shift_b)

    return out3.reshape(N, C, H, W)


def _reference(x, gamma, beta):
    C = x.shape[1]
    mean = jnp.mean(x, axis=(0, 2, 3), keepdims=True)
    var = jnp.mean((x - mean) ** 2, axis=(0, 2, 3), keepdims=True)
    return ((x - mean) * lax.rsqrt(var + EPS)
            * gamma.reshape(1, C, 1, 1) + beta.reshape(1, C, 1, 1))


if __name__ == "__main__":
    key = jax.random.PRNGKey(0)

    # ---- case 1: N=2, C=4, H=W=16 (matches the module's conv BN usage) ----
    N, C, H, W = 2, 4, 16, 16
    k_x, k_w0, k_b0, k_w1, k_b1, k2 = jax.random.split(key, 6)
    x = jax.random.normal(k_x, (N, C, H, W), dtype=jnp.float32)

    # Deterministic synthetic BatchNorm parameters for layer_0 and layer_1.
    w0 = jax.random.normal(k_w0, (C,), dtype=jnp.float32) * 0.1 + 1.0
    b0 = jax.random.normal(k_b0, (C,), dtype=jnp.float32) * 0.1
    w1 = jax.random.normal(k_w1, (C,), dtype=jnp.float32) * 0.1 + 1.0
    b1 = jax.random.normal(k_b1, (C,), dtype=jnp.float32) * 0.1
    p_out = jnp.array([2, 0, 3, 1], dtype=jnp.int32)

    # STE merge (forward value of the straight-through trick is the merged value).
    gamma = 0.5 * (w0 + w1[p_out])
    beta = 0.5 * (b0 + b1[p_out])

    y_ref = _reference(x, gamma, beta)

    # fused single-read path
    y = jax.block_until_ready(ste_bnorm_forward(x, gamma, beta))
    assert jnp.allclose(y, y_ref, atol=1e-4, rtol=1e-4), "fused path mismatch"

    # two-pass fallback path (tiny tiles to exercise multi-step accumulation)
    y2 = jax.block_until_ready(
        ste_bnorm_forward(x, gamma, beta, force_two_pass=True, target_tile_bytes=2048))
    assert jnp.allclose(y2, y_ref, atol=1e-4, rtol=1e-4), "two-pass path mismatch"

    # ---- case 2: odd spatial size (HW=49) exercises the non-128 lane path ----
    N2, C2, H2, W2 = 4, 8, 7, 7
    k_x2, k_g2, k_b2 = jax.random.split(k2, 3)
    x2 = jax.random.normal(k_x2, (N2, C2, H2, W2), dtype=jnp.float32)
    gamma2 = jax.random.normal(k_g2, (C2,), dtype=jnp.float32) * 0.1 + 1.0
    beta2 = jax.random.normal(k_b2, (C2,), dtype=jnp.float32) * 0.1
    y2_ref = _reference(x2, gamma2, beta2)

    y3 = jax.block_until_ready(ste_bnorm_forward(x2, gamma2, beta2))
    assert jnp.allclose(y3, y2_ref, atol=1e-4, rtol=1e-4), "fused odd-HW mismatch"

    y4 = jax.block_until_ready(
        ste_bnorm_forward(x2, gamma2, beta2, force_two_pass=True, target_tile_bytes=2048))
    assert jnp.allclose(y4, y2_ref, atol=1e-4, rtol=1e-4), "two-pass odd-HW mismatch"

    print("KERNEL_OK")
</pallas_src>

<mosaic_0001>
module attributes {stable_mosaic.version = 11 : i64} {
  func.func @fused_kernel(%arg0: i32, %arg1: memref<2x4x256xf32, #tpu.memory_space<vmem>>, %arg2: memref<4x1xf32, #tpu.memory_space<vmem>>, %arg3: memref<4x1xf32, #tpu.memory_space<vmem>>, %arg4: memref<2x4x256xf32, #tpu.memory_space<vmem>>) attributes {dimension_semantics = [#tpu.dimension_semantics<parallel>], iteration_bounds = array<i64: 1>, scalar_prefetch = 0 : i64, scratch_operands = 0 : i64, tpu.core_type = #tpu.core_type<tc>, window_params = [{transform_indices = @transform_0, window_bounds = array<i64: 2, 4, 256>}, {transform_indices = @transform_1, window_bounds = array<i64: 4, 1>}, {transform_indices = @transform_2, window_bounds = array<i64: 4, 1>}, {transform_indices = @transform_3, window_bounds = array<i64: 2, 4, 256>}]} {
    %c0 = arith.constant 0 : index
    %c0_0 = arith.constant 0 : index
    %c0_1 = arith.constant 0 : index
    %0 = vector.load %arg1[%c0, %c0_0, %c0_1] : memref<2x4x256xf32, #tpu.memory_space<vmem>>, vector<2x4x256xf32>
    %cst = arith.constant dense<0.000000e+00> : vector<4x256xf32>
    %1 = vector.multi_reduction <add>, %0, %cst [0] : vector<2x4x256xf32> to vector<4x256xf32>
    %2 = arith.mulf %0, %0 : vector<2x4x256xf32>
    %cst_2 = arith.constant dense<0.000000e+00> : vector<4x256xf32>
    %3 = vector.multi_reduction <add>, %2, %cst_2 [0] : vector<2x4x256xf32> to vector<4x256xf32>
    %cst_3 = arith.constant dense<0.000000e+00> : vector<4xf32>
    %4 = vector.multi_reduction <add>, %1, %cst_3 [1] : vector<4x256xf32> to vector<4xf32>
    %5 = vector.shape_cast %4 : vector<4xf32> to vector<4x1xf32>
    %cst_4 = arith.constant dense<0.000000e+00> : vector<4xf32>
    %6 = vector.multi_reduction <add>, %3, %cst_4 [1] : vector<4x256xf32> to vector<4xf32>
    %7 = vector.shape_cast %6 : vector<4xf32> to vector<4x1xf32>
    %cst_5 = arith.constant 0.001953125 : f32
    %8 = vector.broadcast %cst_5 : f32 to vector<4x1xf32>
    %9 = arith.mulf %5, %8 : vector<4x1xf32>
    %cst_6 = arith.constant 0.001953125 : f32
    %10 = vector.broadcast %cst_6 : f32 to vector<4x1xf32>
    %11 = arith.mulf %7, %10 : vector<4x1xf32>
    %12 = arith.mulf %9, %9 : vector<4x1xf32>
    %13 = arith.subf %11, %12 : vector<4x1xf32>
    %cst_7 = arith.constant 0.000000e+00 : f32
    %14 = vector.broadcast %cst_7 : f32 to vector<4x1xf32>
    %15 = arith.maximumf %13, %14 : vector<4x1xf32>
    %cst_8 = arith.constant 9.99999974E-6 : f32
    %16 = vector.broadcast %cst_8 : f32 to vector<4x1xf32>
    %17 = arith.addf %15, %16 : vector<4x1xf32>
    %18 = math.rsqrt %17 : vector<4x1xf32>
    %c0_9 = arith.constant 0 : index
    %c0_10 = arith.constant 0 : index
    %19 = vector.load %arg2[%c0_9, %c0_10] : memref<4x1xf32, #tpu.memory_space<vmem>>, vector<4x1xf32>
    %20 = arith.mulf %19, %18 : vector<4x1xf32>
    %c0_11 = arith.constant 0 : index
    %c0_12 = arith.constant 0 : index
    %21 = vector.load %arg3[%c0_11, %c0_12] : memref<4x1xf32, #tpu.memory_space<vmem>>, vector<4x1xf32>
    %22 = arith.mulf %9, %20 : vector<4x1xf32>
    %23 = arith.subf %21, %22 : vector<4x1xf32>
    %24 = vector.shape_cast %20 : vector<4x1xf32> to vector<1x4x1xf32>
    %25 = vector.broadcast %24 : vector<1x4x1xf32> to vector<2x4x256xf32>
    %26 = arith.mulf %0, %25 : vector<2x4x256xf32>
    %27 = vector.shape_cast %23 : vector<4x1xf32> to vector<1x4x1xf32>
    %28 = vector.broadcast %27 : vector<1x4x1xf32> to vector<2x4x256xf32>
    %29 = arith.addf %26, %28 : vector<2x4x256xf32>
    %c0_13 = arith.constant 0 : index
    %c0_14 = arith.constant 0 : index
    %c0_15 = arith.constant 0 : index
    %30 = vector.load %arg4[%c0_13, %c0_14, %c0_15] : memref<2x4x256xf32, #tpu.memory_space<vmem>>, vector<2x4x256xf32>
    tpu.vector_store %arg4[%c0_13, %c0_14, %c0_15], %29 {strides = array<i32>} : memref<2x4x256xf32, #tpu.memory_space<vmem>>, vector<2x4x256xf32>,
    return
  }
  func.func @transform_0(%arg0: i32) -> (i32, i32, i32) {
    %c0_i32 = arith.constant 0 : i32
    %c0_i32_0 = arith.constant 0 : i32
    %c0_i32_1 = arith.constant 0 : i32
    return %c0_i32, %arg0, %c0_i32_0 : i32, i32, i32
  }
  func.func @transform_1(%arg0: i32) -> (i32, i32) {
    %c0_i32 = arith.constant 0 : i32
    %c0_i32_0 = arith.constant 0 : i32
    return %arg0, %c0_i32 : i32, i32
  }
  func.func @transform_2(%arg0: i32) -> (i32, i32) {
    %c0_i32 = arith.constant 0 : i32
    %c0_i32_0 = arith.constant 0 : i32
    return %arg0, %c0_i32 : i32, i32
  }
  func.func @transform_3(%arg0: i32) -> (i32, i32, i32) {
    %c0_i32 = arith.constant 0 : i32
    %c0_i32_0 = arith.constant 0 : i32
    %c0_i32_1 = arith.constant 0 : i32
    return %c0_i32, %arg0, %c0_i32_0 : i32, i32, i32
  }
}

</mosaic_0001>

<bundles_post_ra>
// kernel: ste_bnorm_forward.1
= control target key start
LH: loop header
LB: loop body
LE: loop exit
PB: predicated region body
PF: predicated region fallthrough
CT: control target
= control target key end

     0   :  { %vm22_vm0 = vcmask 1043456   ;;  %v107_v26 = vmov 0   ;;  %v108_v41 = vmov 839922192   ;;  %v72_v43 = vlaneseq  ;;  %s159_s0 = inlined_call_operand.vmem [shape: f32[2,4,256], index: 0, kind: input, shape index: {}]   ;;  %s160_s1 = inlined_call_operand.vmem [shape: f32[4,1], index: 1, kind: input, shape index: {}]   ;;  %s161_s2 = inlined_call_operand.vmem [shape: f32[4,1], index: 2, kind: input, shape index: {}]   ;;  %s162_s3 = inlined_call_operand.vmem [shape: f32[2,4,256], index: 3, kind: output, shape index: {}]  }
   0x1   :  { %v14_v0 = vld [vmem:[%s159_s0] sm:$0xff]  ;;  %v15_v1 = vld [vmem:[%s159_s0 + $0x8] sm:$0xff]  ;;  %101 = vset.pattern.permute.xlu1 %v107_v26  ;;  %102 = vset.pattern.permute.xlu0 %v107_v26  ;;  %v70_v42 = vunpack.c.l.s4 %v108_v41 }
   0x2   :  { %v18_v2 = vcombine.high %v14_v0, %v14_v0  ;;  %v19_v3 = vcombine.high %v15_v1, %v15_v1  ;;  %v23_v4 = vsel %vm22_vm0, %v14_v0, 0.0  ;;  %v24_v5 = vsel %vm22_vm0, %v15_v1, 0.0  ;;  %v60_v35 = vld [vmem:[%s160_s1] sm:$0xf] }
   0x3   :  { %v25_v6 = vadd.f32 %v24_v5, %v23_v4  ;;  %v29_v7 = vmul.f32 %v14_v0, %v14_v0  ;;  %v30_v8 = vmul.f32 %v15_v1, %v15_v1  ;;  %v62_v38 = vld [vmem:[%s161_s2] sm:$0xf]  ;;  %v71_v44 = vunpack.c.0.s8 %v70_v42 }
   0x4   :  { %v26_v9 = vsel %vm22_vm0, %v18_v2, 0.0  ;;  %v27_v10 = vsel %vm22_vm0, %v19_v3, 0.0  ;;  %v73_v45 = vshrl.u32 %v72_v43, 7 }
   0x5   :  { %v28_v11 = vadd.f32 %v27_v10, %v26_v9  ;;  %v43_v12 = vsel %vm22_vm0, %v25_v6, 0.0  ;;  %v33_v13 = vcombine.high %v29_v7, %v29_v7  ;;  %v34_v14 = vcombine.high %v30_v8, %v30_v8 }
   0x6   :  { %v37_v15 = vsel %vm22_vm0, %v29_v7, 0.0  ;;  %v38_v16 = vsel %vm22_vm0, %v30_v8, 0.0  ;;  %v74_v46 = vsub.s32 %v71_v44, %v73_v45 }
   0x7   :  { %v44_v17 = vsel %vm22_vm0, %v28_v11, 0.0  ;;  %v39_v18 = vadd.f32 %v38_v16, %v37_v15  ;;  %v40_v19 = vsel %vm22_vm0, %v33_v13, 0.0  ;;  %v41_v20 = vsel %vm22_vm0, %v34_v14, 0.0 }
   0x8   :  { %v45_v21 = vadd.f32 %v44_v17, %v43_v12  ;;  %v42_v22 = vadd.f32 %v41_v20, %v40_v19 }
   0x9   :  { %v48_v23 = vsel %vm22_vm0, %v39_v18, 0.0 }
   0xa   :  { %46 = vadd.xlane.f32.xlu0 %v45_v21  ;;  %v49_v24 = vsel %vm22_vm0, %v42_v22, 0.0 }
   0xb   :  { %v50_v25 = vadd.f32 %v49_v24, %v48_v23 }
   0xe   :  { %51 = vadd.xlane.f32.xlu0 %v50_v25 }
  0x97   :  { %v47_v27 = vpop.xlane.xlu0 %46 }
  0x98   :  { %v53_v28 = vmul.f32 0.001953125, %v47_v27 }
  0x9a   :  { %v55_v30 = vmul.f32 %v53_v28, %v53_v28 }
  0x9b   :  { %v52_v29 = vpop.xlane.xlu0 %51 }
  0x9c   :  { %v54_v31 = vmul.f32 0.001953125, %v52_v29 }
  0x9e   :  { %v56_v32 = vsub.f32 %v54_v31, %v55_v30 }
  0xa0   :  { %v57_v33 = vmax.f32 %v56_v32, 0.0 }
  0xa2   :  { %v58_v34 = vadd.f32 1e-05, %v57_v33 }
  0xa4   :  { %105 = vrsqrt.f32 %v58_v34 }
  0xae   :  { %v106_v36 = vpop.eup %105 }
  0xaf   :  { %v61_v37 = vmul.f32 %v106_v36, %v60_v35 }
  0xb1   :  { %67 = vperm.xlu1 %101, %v61_v37   ;;  %v63_v39 = vmul.f32 %v61_v37, %v53_v28 }
  0xb3   :  { %v64_v40 = vsub.f32 %v62_v38, %v63_v39 }
  0xb5   :  { %81 = vperm.xlu1 %101, %v64_v40  }
 0x130   :  { %v68_v47 = vpop.permute.xlu1 %67 }
 0x131   :  { %v75_v48 = vrot.slane %v68_v47, %v74_v46 }
 0x133   :  { %v77_v50 = vmul.f32 %v75_v48, %v14_v0  ;;  %v78_v51 = vmul.f32 %v75_v48, %v15_v1 }
 0x134   :  { %v82_v49 = vpop.permute.xlu1 %81 }
 0x135   :  { %v89_v52 = vrot.slane %v82_v49, %v74_v46 }
 0x137   :  { %v91_v53 = vadd.f32 %v89_v52, %v77_v50  ;;  %v92_v54 = vadd.f32 %v89_v52, %v78_v51 }
 0x139   :  { %93 = vst [vmem:[%s162_s3] sm:$0xff] %v91_v53  ;;  %94 = vst [vmem:[%s162_s3 + $0x8] sm:$0xff] %v92_v54 }

</bundles_post_ra>
